<compile_context>
chip_gen: v5e
topology: v5e:2x2
jax: 0.10.0
libtpu: 0.0.40
codegen_flags: <defaults>
</compile_context>

<pallas_src>
import functools

import jax
import jax.numpy as jnp
from jax.experimental import pallas as pl
from jax.experimental.pallas import tpu as pltpu

LANE = 128       # TPU lane width: hidden/output feature dims are padded to this.
IN_LANES = 32    # input features padded only to 32 lanes (block dim == array dim is legal).
NUM_LAYERS = 4
MIN_TB = 256     # batch-tile granularity (multiple of every sublane requirement).


def _round_up(n, m):
    return ((n + m - 1) // m) * m


# ---------------------------------------------------------------------------
# Kernel
# ---------------------------------------------------------------------------
def qnetwork_kernel(x_ref, w1_ref, w_ref, out_ref):
    """One batch tile of the 4-layer MLP, biases folded into the matmuls.

    x_ref:   [TB, 32]       bf16  state padded to 32 lanes; lane 31 = constant 1.0
    w1_ref:  [32, 128]      bf16  fc1 weights; row 31 = fc1 bias; [31,127] = 1.0
    w_ref:   [3, 128, 128]  bf16  fc2..fc4 weights; row 127 = bias; [127,127] = 1.0
    out_ref: [TB, 128]      bf16  Q-values in lanes [:action_size] (lane 127 = 1.0)
    """
    # Layer 0: bias enters via the constant-1 lane hitting the packed bias row.
    z = jnp.dot(x_ref[...], w1_ref[...], preferred_element_type=jnp.float32)
    # ReLU then keep the inter-layer activation in bf16 (halves VMEM/vreg
    # traffic; cast is monotone and cast(0)==0 so this equals cast-then-ReLU).
    h = jnp.maximum(z, 0.0).astype(jnp.bfloat16)
    for l in range(NUM_LAYERS - 1):
        z = jnp.dot(h, w_ref[l], preferred_element_type=jnp.float32)
        if l < NUM_LAYERS - 2:
            h = jnp.maximum(z, 0.0).astype(jnp.bfloat16)
        else:
            out_ref[...] = z.astype(out_ref.dtype)   # lane-dense bf16 store


# ---------------------------------------------------------------------------
# Wrapper (batched training-forward path)
# ---------------------------------------------------------------------------
@functools.partial(jax.jit, static_argnames=("action_size", "tb"))
def qnetwork_forward(x, w1_slab, w_slab, *, action_size, tb=4096):
    """x: [B, state_size] f32. Returns [B, action_size] f32 Q-values."""
    B, F = x.shape
    assert F < IN_LANES, "need a free input lane for the fused-bias constant 1.0"

    # Pick the batch tile: the biggest requested tile that fits the (rounded)
    # batch, but keep >= 2 grid steps when the batch allows it so the batch
    # grid can genuinely split across v7x's two TensorCores.
    bp_min = _round_up(B, MIN_TB)
    tb_eff = min(_round_up(tb, MIN_TB),
                 max(MIN_TB, _round_up(bp_min // 2, MIN_TB)))
    Bp = pl.cdiv(B, tb_eff) * tb_eff
    grid = Bp // tb_eff

    # bf16 input stream: lane-pad (to 32 lanes only) and cast together.
    # Lane 31 carries the constant 1.0 that feeds the packed bias rows.
    xp = jnp.zeros((Bp, IN_LANES), jnp.bfloat16)
    xp = xp.at[:B, :F].set(x.astype(jnp.bfloat16))
    xp = xp.at[:, IN_LANES - 1].set(1.0)

    flops = 2 * Bp * (IN_LANES * LANE + (NUM_LAYERS - 1) * LANE * LANE)
    bytes_accessed = 2 * (Bp * IN_LANES + Bp * LANE
                          + IN_LANES * LANE + (NUM_LAYERS - 1) * LANE * LANE)

    out = pl.pallas_call(
        qnetwork_kernel,
        out_shape=jax.ShapeDtypeStruct((Bp, LANE), jnp.bfloat16),
        grid_spec=pltpu.PrefetchScalarGridSpec(
            num_scalar_prefetch=0,
            grid=(grid,),
            in_specs=[
                # Activation tile streams along the batch grid (double-buffered).
                pl.BlockSpec((tb_eff, IN_LANES), lambda i: (i, 0)),
                # Packed weights (+fused biases): resident across the whole grid.
                pl.BlockSpec((IN_LANES, LANE), lambda i: (0, 0)),
                pl.BlockSpec((NUM_LAYERS - 1, LANE, LANE), lambda i: (0, 0, 0)),
            ],
            out_specs=pl.BlockSpec((tb_eff, LANE), lambda i: (i, 0)),
        ),
        compiler_params=pltpu.CompilerParams(
            # Lets the batch grid shard across v7x's two TensorCores; no-op on
            # single-TC v5e/v6e.
            dimension_semantics=("parallel",),
            # Explicit scoped-VMEM cap: raises v5e's 16 MiB default, matches the
            # v6e/v7x defaults, and stays well inside v7x's 64 MiB physical VMEM.
            vmem_limit_bytes=32 * 1024 * 1024,
        ),
        cost_estimate=pl.CostEstimate(flops=flops, transcendentals=0,
                                      bytes_accessed=bytes_accessed),
    )(xp, w1_slab, w_slab)

    return out[:B, :action_size].astype(jnp.float32)


# ---------------------------------------------------------------------------
# Parameters (mimics torch.nn.Linear default init), packing, references
# ---------------------------------------------------------------------------
def init_linear(key, fan_in, fan_out):
    kw, kb = jax.random.split(key)
    bound = 1.0 / (fan_in ** 0.5)
    # Stored as [in, out] so forward is x @ W + b.
    w = jax.random.uniform(kw, (fan_in, fan_out), jnp.float32, -bound, bound)
    b = jax.random.uniform(kb, (fan_out,), jnp.float32, -bound, bound)
    return w, b


def make_params(key, state_size, action_size,
                fc1_units=50, fc2_units=35, fc3_units=10):
    k1, k2, k3, k4 = jax.random.split(key, 4)
    return {
        "fc1": init_linear(k1, state_size, fc1_units),
        "fc2": init_linear(k2, fc1_units, fc2_units),
        "fc3": init_linear(k3, fc2_units, fc3_units),
        "fc4": init_linear(k4, fc3_units, action_size),
    }


def pack_params(params):
    """Pack weights into lane-padded bf16 slabs with the bias folded in.

    Invariant (must be re-enforced after any in-place parameter update):
      - padded rows/cols are exactly 0,
      - the bias row (last input row) holds the bias in cols [:fan_out] and a
        1.0 in the last column, so the constant-1 activation lane both injects
        the bias and re-propagates itself through every ReLU.
    """
    fc1_w, fc1_b = params["fc1"]
    fi, fo = fc1_w.shape
    assert fi < IN_LANES and fo < LANE
    w1_slab = jnp.zeros((IN_LANES, LANE), jnp.float32)
    w1_slab = w1_slab.at[:fi, :fo].set(fc1_w)
    w1_slab = w1_slab.at[IN_LANES - 1, :fo].set(fc1_b)     # fused bias row
    w1_slab = w1_slab.at[IN_LANES - 1, LANE - 1].set(1.0)  # keep constant lane alive

    w_slab = jnp.zeros((NUM_LAYERS - 1, LANE, LANE), jnp.float32)
    for i, name in enumerate(("fc2", "fc3", "fc4")):
        w, b = params[name]
        fi, fo = w.shape
        assert fi < LANE and fo < LANE
        w_slab = w_slab.at[i, :fi, :fo].set(w)
        w_slab = w_slab.at[i, LANE - 1, :fo].set(b)
        w_slab = w_slab.at[i, LANE - 1, LANE - 1].set(1.0)

    return w1_slab.astype(jnp.bfloat16), w_slab.astype(jnp.bfloat16)


def qnetwork_reference_f32(x, params):
    """Pure-f32 reference == the PyTorch module's semantics."""
    h = x
    for name in ("fc1", "fc2", "fc3"):
        w, b = params[name]
        h = jnp.maximum(h @ w + b, 0.0)
    w, b = params["fc4"]
    return h @ w + b


def qnetwork_reference_bf16(x, params):
    """Reference matching the kernel's precision (bf16 operands/activations/bias,
    f32 MXU accumulation, bf16 final store)."""
    h = x.astype(jnp.bfloat16)
    for l, name in enumerate(("fc1", "fc2", "fc3", "fc4")):
        w, b = params[name]
        z = jnp.dot(h, w.astype(jnp.bfloat16),
                    preferred_element_type=jnp.float32)
        z = z + b.astype(jnp.bfloat16).astype(jnp.float32)
        if l < 3:
            h = jnp.maximum(z, 0.0).astype(jnp.bfloat16)
        else:
            h = z.astype(jnp.bfloat16)
    return h.astype(jnp.float32)


def qnetwork_act(state, params):
    """Small-batch online action-selection path: plain jnp (XLA fuses the 4
    GEMVs); the Pallas kernel is reserved for batched training forwards."""
    return qnetwork_reference_f32(state, params)


# ---------------------------------------------------------------------------
# Demo / correctness check
# ---------------------------------------------------------------------------
if __name__ == "__main__":
    STATE_SIZE = 25        # 5x5 grid-world observation
    ACTION_SIZE = 4        # up / down / left / right
    BATCH = 1024           # replay-minibatch scale -> tb_eff=512, grid=(2,)

    key = jax.random.PRNGKey(0)
    k_params, k_state = jax.random.split(key)

    params = make_params(k_params, STATE_SIZE, ACTION_SIZE)
    w1_slab, w_slab = pack_params(params)
    states = jax.random.normal(k_state, (BATCH, STATE_SIZE), dtype=jnp.float32)

    # Batched forward through the Pallas kernel.
    q_vals = qnetwork_forward(states, w1_slab, w_slab, action_size=ACTION_SIZE)
    q_vals = jax.block_until_ready(q_vals)
    assert q_vals.shape == (BATCH, ACTION_SIZE)

    # Tight check vs a precision-matched reference (bf16 operands/bias/output,
    # f32 accumulation). Small slack for accumulation-order / rounding ties.
    q_bf16_ref = qnetwork_reference_bf16(states, params)
    assert jnp.allclose(q_vals, q_bf16_ref, atol=2e-2, rtol=2e-2), \
        "mismatch vs bf16-matched reference"

    # Loose check vs the exact f32 semantics of the original module
    # (only bf16 rounding of weights/bias/activations separates the two).
    q_f32_ref = qnetwork_reference_f32(states, params)
    assert jnp.allclose(q_vals, q_f32_ref, atol=1e-1, rtol=1e-1), \
        "mismatch vs f32 reference"

    # Ragged batch (not a multiple of the tile) goes through the same kernel.
    q_small = qnetwork_forward(states[:7], w1_slab, w_slab,
                               action_size=ACTION_SIZE)
    q_small = jax.block_until_ready(q_small)
    assert jnp.allclose(q_small, q_bf16_ref[:7], atol=2e-2, rtol=2e-2)

    # Online action-selection path (B=1) stays in plain jnp on purpose.
    a = jnp.argmax(qnetwork_act(states[:1], params), axis=-1)
    assert a.shape == (1,)

    # TODO(synk): optionally fuse the downstream max_a Q / Q(s,a) gather into the
    # kernel to shrink the output writeback further (changes the forward API).
    print("KERNEL_OK")
</pallas_src>

<mosaic_0001>
module attributes {stable_mosaic.version = 11 : i64} {
  func.func @qnetwork_kernel(%arg0: i32, %arg1: memref<512x32xbf16, #tpu.memory_space<vmem>>, %arg2: memref<32x128xbf16, #tpu.memory_space<vmem>>, %arg3: memref<3x128x128xbf16, #tpu.memory_space<vmem>>, %arg4: memref<512x128xbf16, #tpu.memory_space<vmem>>) attributes {dimension_semantics = [#tpu.dimension_semantics<parallel>], iteration_bounds = array<i64: 2>, scalar_prefetch = 0 : i64, scratch_operands = 0 : i64, tpu.core_type = #tpu.core_type<tc>, window_params = [{transform_indices = @transform_0, window_bounds = array<i64: 512, 32>}, {pipeline_mode = #tpu.pipeline_mode<synchronous>, transform_indices = @transform_1, window_bounds = array<i64: 32, 128>}, {pipeline_mode = #tpu.pipeline_mode<synchronous>, transform_indices = @transform_2, window_bounds = array<i64: 3, 128, 128>}, {transform_indices = @transform_3, window_bounds = array<i64: 512, 128>}]} {
    %c0 = arith.constant 0 : index
    %c0_0 = arith.constant 0 : index
    %0 = vector.load %arg1[%c0, %c0_0] : memref<512x32xbf16, #tpu.memory_space<vmem>>, vector<512x32xbf16>
    %c0_1 = arith.constant 0 : index
    %c0_2 = arith.constant 0 : index
    %1 = vector.load %arg2[%c0_1, %c0_2] : memref<32x128xbf16, #tpu.memory_space<vmem>>, vector<32x128xbf16>
    %cst = arith.constant dense<0.000000e+00> : vector<512x128xf32>
    %2 = tpu.matmul %0, %1, %cst {dimension_numbers = #tpu.dot_dimension_numbers<[1], [0], [0], [1], [0, 0, 1, 1], [], []>} : vector<512x32xbf16>, vector<32x128xbf16>, vector<512x128xf32> -> vector<512x128xf32>
    %cst_3 = arith.constant 0.000000e+00 : f32
    %3 = vector.broadcast %cst_3 : f32 to vector<512x128xf32>
    %4 = arith.maximumf %2, %3 : vector<512x128xf32>
    %5 = arith.truncf %4 : vector<512x128xf32> to vector<512x128xbf16>
    %c0_4 = arith.constant 0 : index
    %c0_5 = arith.constant 0 : index
    %c0_6 = arith.constant 0 : index
    %6 = vector.load %arg3[%c0_4, %c0_5, %c0_6] : memref<3x128x128xbf16, #tpu.memory_space<vmem>>, vector<1x128x128xbf16>
    %7 = vector.shape_cast %6 : vector<1x128x128xbf16> to vector<128x128xbf16>
    %cst_7 = arith.constant dense<0.000000e+00> : vector<512x128xf32>
    %8 = tpu.matmul %5, %7, %cst_7 {dimension_numbers = #tpu.dot_dimension_numbers<[1], [0], [0], [1], [0, 0, 1, 1], [], []>} : vector<512x128xbf16>, vector<128x128xbf16>, vector<512x128xf32> -> vector<512x128xf32>
    %cst_8 = arith.constant 0.000000e+00 : f32
    %9 = vector.broadcast %cst_8 : f32 to vector<512x128xf32>
    %10 = arith.maximumf %8, %9 : vector<512x128xf32>
    %11 = arith.truncf %10 : vector<512x128xf32> to vector<512x128xbf16>
    %c1 = arith.constant 1 : index
    %c0_9 = arith.constant 0 : index
    %c0_10 = arith.constant 0 : index
    %12 = vector.load %arg3[%c1, %c0_9, %c0_10] : memref<3x128x128xbf16, #tpu.memory_space<vmem>>, vector<1x128x128xbf16>
    %13 = vector.shape_cast %12 : vector<1x128x128xbf16> to vector<128x128xbf16>
    %cst_11 = arith.constant dense<0.000000e+00> : vector<512x128xf32>
    %14 = tpu.matmul %11, %13, %cst_11 {dimension_numbers = #tpu.dot_dimension_numbers<[1], [0], [0], [1], [0, 0, 1, 1], [], []>} : vector<512x128xbf16>, vector<128x128xbf16>, vector<512x128xf32> -> vector<512x128xf32>
    %cst_12 = arith.constant 0.000000e+00 : f32
    %15 = vector.broadcast %cst_12 : f32 to vector<512x128xf32>
    %16 = arith.maximumf %14, %15 : vector<512x128xf32>
    %17 = arith.truncf %16 : vector<512x128xf32> to vector<512x128xbf16>
    %c2 = arith.constant 2 : index
    %c0_13 = arith.constant 0 : index
    %c0_14 = arith.constant 0 : index
    %18 = vector.load %arg3[%c2, %c0_13, %c0_14] : memref<3x128x128xbf16, #tpu.memory_space<vmem>>, vector<1x128x128xbf16>
    %19 = vector.shape_cast %18 : vector<1x128x128xbf16> to vector<128x128xbf16>
    %cst_15 = arith.constant dense<0.000000e+00> : vector<512x128xf32>
    %20 = tpu.matmul %17, %19, %cst_15 {dimension_numbers = #tpu.dot_dimension_numbers<[1], [0], [0], [1], [0, 0, 1, 1], [], []>} : vector<512x128xbf16>, vector<128x128xbf16>, vector<512x128xf32> -> vector<512x128xf32>
    %21 = arith.truncf %20 : vector<512x128xf32> to vector<512x128xbf16>
    %c0_16 = arith.constant 0 : index
    %c0_17 = arith.constant 0 : index
    %22 = vector.load %arg4[%c0_16, %c0_17] : memref<512x128xbf16, #tpu.memory_space<vmem>>, vector<512x128xbf16>
    tpu.vector_store %arg4[%c0_16, %c0_17], %21 {strides = array<i32>} : memref<512x128xbf16, #tpu.memory_space<vmem>>, vector<512x128xbf16>,
    return
  }
  func.func @transform_0(%arg0: i32) -> (i32, i32) {
    %c0_i32 = arith.constant 0 : i32
    %c0_i32_0 = arith.constant 0 : i32
    return %arg0, %c0_i32 : i32, i32
  }
  func.func @transform_1(%arg0: i32) -> (i32, i32) {
    %c0_i32 = arith.constant 0 : i32
    %c0_i32_0 = arith.constant 0 : i32
    %c0_i32_1 = arith.constant 0 : i32
    return %c0_i32, %c0_i32_0 : i32, i32
  }
  func.func @transform_2(%arg0: i32) -> (i32, i32, i32) {
    %c0_i32 = arith.constant 0 : i32
    %c0_i32_0 = arith.constant 0 : i32
    %c0_i32_1 = arith.constant 0 : i32
    %c0_i32_2 = arith.constant 0 : i32
    return %c0_i32, %c0_i32_0, %c0_i32_1 : i32, i32, i32
  }
  func.func @transform_3(%arg0: i32) -> (i32, i32) {
    %c0_i32 = arith.constant 0 : i32
    %c0_i32_0 = arith.constant 0 : i32
    return %arg0, %c0_i32 : i32, i32
  }
}

</mosaic_0001>

<bundles_post_ra>
// kernel: qnetwork_forward.1
= control target key start
LH: loop header
LB: loop body
LE: loop exit
PB: predicated region body
PF: predicated region fallthrough
CT: control target
= control target key end

     0   :  { %s2446_s12 = smov 0   ;;  %s2648_s0 = inlined_call_operand.vmem [shape: bf16[1024,32], index: 0, kind: input, shape index: {}]   ;;  %s2649_s1 = inlined_call_operand.vmem [shape: bf16[32,128], index: 1, kind: input, shape index: {}]   ;;  %s2650_s2 = inlined_call_operand.vmem [shape: bf16[3,128,128], index: 2, kind: input, shape index: {}]   ;;  %s2651_s3 = inlined_call_operand.vmem [shape: bf16[1024,128], index: 3, kind: output, shape index: {}]  }
   0x1 LB: > { %s1854_s13 = sadd.s32 4294967295, %s2424_s12   ;;  %p1858_p0 = scmp.ge.s32.totalorder %s2424_s12, 1  ;;  %s2424_s12 = sphi %s2446_s12, %s13_s12  }
   0x2   : > { %p138_p1 = scmp.lt.s32.totalorder %s2424_s12, 3 }
   0x4   : > { %p139_p2 = pnand %p1858_p0, %p138_p1 }
   0x5   : > { %s1859_s16 = sshll.u32 (!%p139_p2), %s1854_s13, 6 }
   0x6   : > { %142 = sbr.rel (%p139_p2) target bundleno = 1079 (0x437), region = 32  ;;  %p163_p3 = scmp.lt.s32.totalorder (!%p139_p2), %s1859_s16, 127 }
   0xb   : > { %v2194_v0 = vld [vmem:[%s2649_s1 + $0x8] sm:$0xff]  ;;  %v2193_v1 = vld [vmem:[%s2649_s1] sm:$0xff]  ;;  %s2653_s16 = smov (!%p163_p3, %s1859_s16), 127  ;;  %vm415_vm0 = vcmask 261120   ;;  %v2202_v7 = vld [vmem:[%s2650_s2 + $0x38] sm:$0xff] }
   0xc   : > { %518 = vmatpush.bf16.msra.mxu0 %v2194_v0  ;;  %s1860_s19 = sshll.u32 %s2653_s16, 2  ;;  %841 = vmatpush.bf16.msra.mxu1 %v2202_v7  ;;  %v2201_v8 = vld [vmem:[%s2650_s2 + $0x30] sm:$0xff]  ;;  %v2200_v10 = vld [vmem:[%s2650_s2 + $0x28] sm:$0xff]  ;;  %v2199_v11 = vld [vmem:[%s2650_s2 + $0x20] sm:$0xff] }
   0xd   : > { %s2468_s22 = scalar_lea.vmem %s2648_s0, %s1860_s19  ;;  %v2198_v12 = vld [vmem:[%s2650_s2 + $0x18] sm:$0xff]  ;;  %v2197_v14 = vld [vmem:[%s2650_s2 + $0x10] sm:$0xff]  ;;  %v2196_v15 = vld [vmem:[%s2650_s2 + $0x8] sm:$0xff]  ;;  %s2611_s26 = scalar_lea.vmem %s2651_s3, %s1860_s19 }
   0xe   : > { %v2161_v2 = vld [vmem:[%s2468_s22] sm:$0xff]  ;;  %v2162_v3 = vld [vmem:[%s2468_s22 + $0x8] sm:$0xff]  ;;  %v2163_v4 = vld [vmem:[%s2468_s22 + $0x10] sm:$0xff] }
   0xf   : > { %v2164_v5 = vld [vmem:[%s2468_s22 + $0x18] sm:$0xff]  ;;  %v2165_v6 = vld [vmem:[%s2468_s22 + $0x20] sm:$0xff]  ;;  %v2166_v9 = vld [vmem:[%s2468_s22 + $0x28] sm:$0xff] }
  0x10   : > { %519 = vmatpush.bf16.msra.mxu0 %v2193_v1  ;;  %842 = vmatpush.bf16.msra.mxu1 %v2201_v8  ;;  %v2167_v13 = vld [vmem:[%s2468_s22 + $0x30] sm:$0xff]  ;;  %v2195_v16 = vld [vmem:[%s2650_s2] sm:$0xff]  ;;  %v2168_v17 = vld [vmem:[%s2468_s22 + $0x38] sm:$0xff] }
  0x11   : > { %v2169_v18 = vld [vmem:[%s2468_s22 + $0x40] sm:$0xff]  ;;  %v2170_v24 = vld [vmem:[%s2468_s22 + $0x48] sm:$0xff]  ;;  %v2171_v30 = vld [vmem:[%s2468_s22 + $0x50] sm:$0xff] }
  0x12   : > { %v2172_v36 = vld [vmem:[%s2468_s22 + $0x58] sm:$0xff]  ;;  %v2173_v42 = vld [vmem:[%s2468_s22 + $0x60] sm:$0xff]  ;;  %v2174_v48 = vld [vmem:[%s2468_s22 + $0x68] sm:$0xff] }
  0x13   : > { %1999 = vmatmul.msk.bf16.vlgmr.msra.gmra.mxu0 %vm415_vm0, %v2161_v2  ;;  %v2210_v50 = vld [vmem:[%s2650_s2 + $0x78] sm:$0xff]  ;;  %v2209_v54 = vld [vmem:[%s2650_s2 + $0x70] sm:$0xff]  ;;  %v2208_v56 = vld [vmem:[%s2650_s2 + $0x68] sm:$0xff] }
  0x14   : > { %843 = vmatpush.bf16.msra.mxu1 %v2200_v10  ;;  %1171 = vmatpush.bf16.msra.mxu2 %v2210_v50  ;;  %v2175_v57 = vld [vmem:[%s2468_s22 + $0x70] sm:$0xff]  ;;  %v2207_v59 = vld [vmem:[%s2650_s2 + $0x60] sm:$0xff]  ;;  %v2206_v60 = vld [vmem:[%s2650_s2 + $0x58] sm:$0xff] }
  0x15   : > { %v2205_v0 = vld [vmem:[%s2650_s2 + $0x50] sm:$0xff]  ;;  %v2204_v2 = vld [vmem:[%s2650_s2 + $0x48] sm:$0xff]  ;;  %v2177_v10 = vld [vmem:[%s2468_s22 + $0x80] sm:$0xff] }
  0x16   : > { %v2181_v50 = vld [vmem:[%s2468_s22 + $0xa0] sm:$0xff] }
  0x18   : > { %844 = vmatpush.bf16.msra.mxu1 %v2199_v11  ;;  %1172 = vmatpush.bf16.msra.mxu2 %v2209_v54 }
  0x1c   : > { %845 = vmatpush.bf16.msra.mxu1 %v2198_v12  ;;  %1173 = vmatpush.bf16.msra.mxu2 %v2208_v56 }
  0x20   : > { %846 = vmatpush.bf16.msra.mxu1 %v2197_v14  ;;  %1174 = vmatpush.bf16.msra.mxu2 %v2207_v59 }
  0x23   : > { %2000 = vmatmul.msk.bf16.gmra.mxu0 %vm415_vm0, %v2162_v3  ;;  %v2176_v3 = vld [vmem:[%s2468_s22 + $0x78] sm:$0xff] }
  0x24   : > { %847 = vmatpush.bf16.msra.mxu1 %v2196_v15  ;;  %1175 = vmatpush.bf16.msra.mxu2 %v2206_v60 }
  0x28   : > { %848 = vmatpush.bf16.msra.mxu1 %v2195_v16  ;;  %1176 = vmatpush.bf16.msra.mxu2 %v2205_v0 }
  0x2c   : > { %1177 = vmatpush.bf16.msra.mxu2 %v2204_v2 }
  0x33   : > { %2001 = vmatmul.msk.bf16.gmra.mxu0 %vm415_vm0, %v2163_v4 }
  0x43   : > { %2002 = vmatmul.msk.bf16.gmra.mxu0 %vm415_vm0, %v2164_v5  ;;  %v2203_v5 = vld [vmem:[%s2650_s2 + $0x40] sm:$0xff] }
  0x44   : > { %1178 = vmatpush.bf16.msra.mxu2 %v2203_v5 }
  0x53   : > { %2003 = vmatmul.msk.bf16.gmra.mxu0 %vm415_vm0, %v2165_v6 }
  0x63   : > { %2004 = vmatmul.msk.bf16.gmra.mxu0 %vm415_vm0, %v2166_v9 }
  0x73   : > { %2005 = vmatmul.msk.bf16.gmra.mxu0 %vm415_vm0, %v2167_v13 }
  0x83   : > { %2006 = vmatmul.msk.bf16.gmra.mxu0 %vm415_vm0, %v2168_v17  ;;  %v2178_v17 = vld [vmem:[%s2468_s22 + $0x88] sm:$0xff] }
  0x90   : > { %v521_v19 = vpop.f32.mrf.mxu0 }
  0x91   : > { %v681_v21 = vmax.f32 %v521_v19, 0.0 }
  0x93   : > { %2007 = vmatmul.msk.bf16.gmra.mxu0 %vm415_vm0, %v2169_v18 }
  0x98   : > { %v523_v20 = vpop.f32.mrf.mxu0 }
  0x99   : > { %v682_v22 = vmax.f32 %v523_v20, 0.0 }
  0x9b   : > { %v745_v23 = vpack.c.bf16 %v682_v22, %v681_v21 }
  0x9d   : > { %849 = vmatmul.bf16.vlgmr.msra.gmra.mxu1 %v745_v23 }
  0xa0   : > { %v526_v25 = vpop.f32.mrf.mxu0 }
  0xa1   : > { %v683_v27 = vmax.f32 %v526_v25, 0.0 }
  0xa3   : > { %2008 = vmatmul.msk.bf16.gmra.mxu0 %vm415_vm0, %v2170_v24 }
  0xa8   : > { %v528_v26 = vpop.f32.mrf.mxu0 }
  0xa9   : > { %v684_v28 = vmax.f32 %v528_v26, 0.0 }
  0xab   : > { %v746_v29 = vpack.c.bf16 %v684_v28, %v683_v27  ;;  %v2179_v28 = vld [vmem:[%s2468_s22 + $0x90] sm:$0xff] }
  0xad   : > { %854 = vmatmul.bf16.gmra.mxu1 %v746_v29 }
  0xb0   : > { %v531_v31 = vpop.f32.mrf.mxu0 }
  0xb1   : > { %v685_v33 = vmax.f32 %v531_v31, 0.0 }
  0xb3   : > { %2009 = vmatmul.msk.bf16.gmra.mxu0 %vm415_vm0, %v2171_v30 }
  0xb8   : > { %v533_v32 = vpop.f32.mrf.mxu0 }
  0xb9   : > { %v686_v34 = vmax.f32 %v533_v32, 0.0 }
  0xbb   : > { %v747_v35 = vpack.c.bf16 %v686_v34, %v685_v33 }
  0xbd   : > { %859 = vmatmul.bf16.gmra.mxu1 %v747_v35 }
  0xc0   : > { %v536_v37 = vpop.f32.mrf.mxu0 }
  0xc1   : > { %v687_v39 = vmax.f32 %v536_v37, 0.0 }
  0xc3   : > { %2010 = vmatmul.msk.bf16.gmra.mxu0 %vm415_vm0, %v2172_v36 }
  0xc8   : > { %v538_v38 = vpop.f32.mrf.mxu0 }
  0xc9   : > { %v688_v40 = vmax.f32 %v538_v38, 0.0 }
  0xcb   : > { %v748_v41 = vpack.c.bf16 %v688_v40, %v687_v39  ;;  %v2180_v39 = vld [vmem:[%s2468_s22 + $0x98] sm:$0xff] }
  0xcd   : > { %864 = vmatmul.bf16.gmra.mxu1 %v748_v41 }
  0xd0   : > { %v541_v43 = vpop.f32.mrf.mxu0 }
  0xd1   : > { %v689_v45 = vmax.f32 %v541_v43, 0.0 }
  0xd3   : > { %2011 = vmatmul.msk.bf16.gmra.mxu0 %vm415_vm0, %v2173_v42 }
  0xd8   : > { %v543_v44 = vpop.f32.mrf.mxu0 }
  0xd9   : > { %v690_v46 = vmax.f32 %v543_v44, 0.0 }
  0xdb   : > { %v749_v47 = vpack.c.bf16 %v690_v46, %v689_v45 }
  0xdd   : > { %869 = vmatmul.bf16.gmra.mxu1 %v749_v47 }
  0xe0   : > { %v546_v49 = vpop.f32.mrf.mxu0 }
  0xe1   : > { %v691_v52 = vmax.f32 %v546_v49, 0.0 }
  0xe3   : > { %2012 = vmatmul.msk.bf16.gmra.mxu0 %vm415_vm0, %v2174_v48 }
  0xe8   : > { %v548_v51 = vpop.f32.mrf.mxu0 }
  0xe9   : > { %v692_v53 = vmax.f32 %v548_v51, 0.0 }
  0xeb   : > { %v750_v55 = vpack.c.bf16 %v692_v53, %v691_v52 }
  0xed   : > { %874 = vmatmul.bf16.gmra.mxu1 %v750_v55 }
  0xf0   : > { %v551_v58 = vpop.f32.mrf.mxu0 }
  0xf1   : > { %v693_v62 = vmax.f32 %v551_v58, 0.0 }
  0xf3   : > { %2013 = vmatmul.msk.bf16.gmra.mxu0 %vm415_vm0, %v2175_v57 }
  0xf8   : > { %v553_v61 = vpop.f32.mrf.mxu0 }
  0xf9   : > { %v694_v63 = vmax.f32 %v553_v61, 0.0  ;;  %v2182_v61 = vld [vmem:[%s2468_s22 + $0xa8] sm:$0xff] }
  0xfb   : > { %v751_v1 = vpack.c.bf16 %v694_v63, %v693_v62 }
  0xfd   : > { %879 = vmatmul.bf16.gmra.mxu1 %v751_v1 }
 0x100   : > { %v556_v4 = vpop.f32.mrf.mxu0 }
 0x101   : > { %v695_v7 = vmax.f32 %v556_v4, 0.0 }
 0x103   : > { %2014 = vmatmul.msk.bf16.gmra.mxu0 %vm415_vm0, %v2176_v3 }
 0x108   : > { %v558_v6 = vpop.f32.mrf.mxu0 }
 0x109   : > { %v696_v8 = vmax.f32 %v558_v6, 0.0 }
 0x10b   : > { %v752_v9 = vpack.c.bf16 %v696_v8, %v695_v7  ;;  %v2183_v8 = vld [vmem:[%s2468_s22 + $0xb0] sm:$0xff] }
 0x10d   : > { %884 = vmatmul.bf16.gmra.mxu1 %v752_v9 }
 0x110   : > { %v561_v11 = vpop.f32.mrf.mxu0 }
 0x111   : > { %v697_v13 = vmax.f32 %v561_v11, 0.0 }
 0x113   : > { %2015 = vmatmul.msk.bf16.gmra.mxu0 %vm415_vm0, %v2177_v10 }
 0x118   : > { %v563_v12 = vpop.f32.mrf.mxu0 }
 0x119   : > { %v698_v14 = vmax.f32 %v563_v12, 0.0 }
 0x11a   : > { %v850_v15 = vpop.f32.mrf.mxu1 }
 0x11b   : > { %v753_v16 = vpack.c.bf16 %v698_v14, %v697_v13  ;;  %v1010_v20 = vmax.f32 %v850_v15, 0.0  ;;  %v2218_v14 = vld [vmem:[%s2650_s2 + $0xb8] sm:$0xff] }
 0x11c   : > { %1501 = vmatpush.bf16.msra.mxu3 %v2218_v14 }
 0x11d   : > { %889 = vmatmul.bf16.gmra.mxu1 %v753_v16 }
 0x120   : > { %v566_v18 = vpop.f32.mrf.mxu0 }
 0x121   : > { %v699_v24 = vmax.f32 %v566_v18, 0.0 }
 0x122   : > { %v852_v19 = vpop.f32.mrf.mxu1 }
 0x123   : > { %v1011_v21 = vmax.f32 %v852_v19, 0.0  ;;  %2016 = vmatmul.msk.bf16.gmra.mxu0 %vm415_vm0, %v2178_v17  ;;  %v2217_v19 = vld [vmem:[%s2650_s2 + $0xb0] sm:$0xff] }
 0x124   : > { %1502 = vmatpush.bf16.msra.mxu3 %v2217_v19 }
 0x125   : > { %v1074_v22 = vpack.c.bf16 %v1011_v21, %v1010_v20  ;;  %v2216_v21 = vld [vmem:[%s2650_s2 + $0xa8] sm:$0xff] }
 0x127   : > { %1179 = vmatmul.bf16.vlgmr.msra.gmra.mxu2 %v1074_v22  ;;  %v2184_v22 = vld [vmem:[%s2468_s22 + $0xb8] sm:$0xff] }
 0x128   : > { %v568_v23 = vpop.f32.mrf.mxu0  ;;  %1503 = vmatpush.bf16.msra.mxu3 %v2216_v21 }
 0x129   : > { %v700_v25 = vmax.f32 %v568_v23, 0.0 }
 0x12a   : > { %v855_v26 = vpop.f32.mrf.mxu1 }
 0x12b   : > { %v754_v27 = vpack.c.bf16 %v700_v25, %v699_v24  ;;  %v1012_v31 = vmax.f32 %v855_v26, 0.0  ;;  %v2215_v25 = vld [vmem:[%s2650_s2 + $0xa0] sm:$0xff] }
 0x12c   : > { %1504 = vmatpush.bf16.msra.mxu3 %v2215_v25 }
 0x12d   : > { %894 = vmatmul.bf16.gmra.mxu1 %v754_v27 }
 0x130   : > { %v571_v29 = vpop.f32.mrf.mxu0 }
 0x131   : > { %v701_v35 = vmax.f32 %v571_v29, 0.0  ;;  %v2214_v29 = vld [vmem:[%s2650_s2 + $0x98] sm:$0xff] }
 0x132   : > { %v857_v30 = vpop.f32.mrf.mxu1  ;;  %1505 = vmatpush.bf16.msra.mxu3 %v2214_v29  ;;  %v2189_v29 = vld [vmem:[%s2468_s22 + $0xe0] sm:$0xff] }
 0x133   : > { %v1013_v32 = vmax.f32 %v857_v30, 0.0  ;;  %2017 = vmatmul.msk.bf16.gmra.mxu0 %vm415_vm0, %v2179_v28 }
 0x135   : > { %v1075_v33 = vpack.c.bf16 %v1013_v32, %v1012_v31 }
 0x137   : > { %1184 = vmatmul.bf16.gmra.mxu2 %v1075_v33 }
 0x138   : > { %v573_v34 = vpop.f32.mrf.mxu0 }
 0x139   : > { %v702_v36 = vmax.f32 %v573_v34, 0.0  ;;  %v2213_v34 = vld [vmem:[%s2650_s2 + $0x90] sm:$0xff] }
 0x13a   : > { %v860_v37 = vpop.f32.mrf.mxu1  ;;  %1506 = vmatpush.bf16.msra.mxu3 %v2213_v34 }
 0x13b   : > { %v755_v38 = vpack.c.bf16 %v702_v36, %v701_v35  ;;  %v1014_v42 = vmax.f32 %v860_v37, 0.0  ;;  %v2212_v36 = vld [vmem:[%s2650_s2 + $0x88] sm:$0xff]  ;;  %v2185_v37 = vld [vmem:[%s2468_s22 + $0xc0] sm:$0xff] }
 0x13d   : > { %899 = vmatmul.bf16.gmra.mxu1 %v755_v38 }
 0x13e   : > { %1507 = vmatpush.bf16.msra.mxu3 %v2212_v36 }
 0x140   : > { %v576_v40 = vpop.f32.mrf.mxu0 }
 0x141   : > { %v703_v46 = vmax.f32 %v576_v40, 0.0  ;;  %v2211_v40 = vld [vmem:[%s2650_s2 + $0x80] sm:$0xff] }
 0x142   : > { %v862_v41 = vpop.f32.mrf.mxu1  ;;  %1508 = vmatpush.bf16.msra.mxu3 %v2211_v40 }
 0x143   : > { %v1015_v43 = vmax.f32 %v862_v41, 0.0  ;;  %2018 = vmatmul.msk.bf16.gmra.mxu0 %vm415_vm0, %v2180_v39 }
 0x145   : > { %v1076_v44 = vpack.c.bf16 %v1015_v43, %v1014_v42 }
 0x147   : > { %1189 = vmatmul.bf16.gmra.mxu2 %v1076_v44 }
 0x148   : > { %v578_v45 = vpop.f32.mrf.mxu0 }
 0x149   : > { %v704_v47 = vmax.f32 %v578_v45, 0.0 }
 0x14a   : > { %v865_v48 = vpop.f32.mrf.mxu1 }
 0x14b   : > { %v756_v49 = vpack.c.bf16 %v704_v47, %v703_v46  ;;  %v1016_v53 = vmax.f32 %v865_v48, 0.0 }
 0x14d   : > { %904 = vmatmul.bf16.gmra.mxu1 %v756_v49  ;;  %v2186_v49 = vld [vmem:[%s2468_s22 + $0xc8] sm:$0xff] }
 0x150   : > { %v581_v51 = vpop.f32.mrf.mxu0 }
 0x151   : > { %v705_v57 = vmax.f32 %v581_v51, 0.0 }
 0x152   : > { %v867_v52 = vpop.f32.mrf.mxu1 }
 0x153   : > { %v1017_v54 = vmax.f32 %v867_v52, 0.0  ;;  %2019 = vmatmul.msk.bf16.gmra.mxu0 %vm415_vm0, %v2181_v50 }
 0x155   : > { %v1077_v55 = vpack.c.bf16 %v1017_v54, %v1016_v53 }
 0x157   : > { %1194 = vmatmul.bf16.gmra.mxu2 %v1077_v55 }
 0x158   : > { %v583_v56 = vpop.f32.mrf.mxu0 }
 0x159   : > { %v706_v58 = vmax.f32 %v583_v56, 0.0 }
 0x15a   : > { %v870_v59 = vpop.f32.mrf.mxu1 }
 0x15b   : > { %v757_v60 = vpack.c.bf16 %v706_v58, %v705_v57  ;;  %v1018_v0 = vmax.f32 %v870_v59, 0.0 }
 0x15d   : > { %909 = vmatmul.bf16.gmra.mxu1 %v757_v60 }
 0x160   : > { %v586_v62 = vpop.f32.mrf.mxu0 }
 0x161   : > { %v707_v4 = vmax.f32 %v586_v62, 0.0 }
 0x162   : > { %v872_v63 = vpop.f32.mrf.mxu1 }
 0x163   : > { %v1019_v1 = vmax.f32 %v872_v63, 0.0  ;;  %2020 = vmatmul.msk.bf16.gmra.mxu0 %vm415_vm0, %v2182_v61  ;;  %v2187_v61 = vld [vmem:[%s2468_s22 + $0xd0] sm:$0xff] }
 0x165   : > { %v1078_v2 = vpack.c.bf16 %v1019_v1, %v1018_v0 }
 0x167   : > { %1199 = vmatmul.bf16.gmra.mxu2 %v1078_v2 }
 0x168   : > { %v588_v3 = vpop.f32.mrf.mxu0 }
 0x169   : > { %v708_v5 = vmax.f32 %v588_v3, 0.0 }
 0x16a   : > { %v875_v6 = vpop.f32.mrf.mxu1 }
 0x16b   : > { %v758_v7 = vpack.c.bf16 %v708_v5, %v707_v4  ;;  %v1020_v11 = vmax.f32 %v875_v6, 0.0 }
 0x16d   : > { %914 = vmatmul.bf16.gmra.mxu1 %v758_v7 }
 0x170   : > { %v591_v9 = vpop.f32.mrf.mxu0 }
 0x171   : > { %v709_v16 = vmax.f32 %v591_v9, 0.0 }
 0x172   : > { %v877_v10 = vpop.f32.mrf.mxu1 }
 0x173   : > { %v1021_v12 = vmax.f32 %v877_v10, 0.0  ;;  %2021 = vmatmul.msk.bf16.gmra.mxu0 %vm415_vm0, %v2183_v8 }
 0x175   : > { %v1079_v13 = vpack.c.bf16 %v1021_v12, %v1020_v11 }
 0x177   : > { %1204 = vmatmul.bf16.gmra.mxu2 %v1079_v13  ;;  %v2188_v13 = vld [vmem:[%s2468_s22 + $0xd8] sm:$0xff] }
 0x178   : > { %v593_v15 = vpop.f32.mrf.mxu0 }
 0x179   : > { %v710_v17 = vmax.f32 %v593_v15, 0.0 }
 0x17a   : > { %v880_v18 = vpop.f32.mrf.mxu1 }
 0x17b   : > { %v759_v20 = vpack.c.bf16 %v710_v17, %v709_v16  ;;  %v1022_v26 = vmax.f32 %v880_v18, 0.0 }
 0x17d   : > { %919 = vmatmul.bf16.gmra.mxu1 %v759_v20 }
 0x180   : > { %v596_v23 = vpop.f32.mrf.mxu0 }
 0x181   : > { %v711_v31 = vmax.f32 %v596_v23, 0.0 }
 0x182   : > { %v882_v24 = vpop.f32.mrf.mxu1 }
 0x183   : > { %v1023_v27 = vmax.f32 %v882_v24, 0.0  ;;  %2022 = vmatmul.msk.bf16.gmra.mxu0 %vm415_vm0, %v2184_v22 }
 0x185   : > { %v1080_v28 = vpack.c.bf16 %v1023_v27, %v1022_v26 }
 0x187   : > { %1209 = vmatmul.bf16.gmra.mxu2 %v1080_v28 }
 0x188   : > { %v598_v30 = vpop.f32.mrf.mxu0 }
 0x189   : > { %v712_v32 = vmax.f32 %v598_v30, 0.0 }
 0x18a   : > { %v885_v33 = vpop.f32.mrf.mxu1 }
 0x18b   : > { %v760_v35 = vpack.c.bf16 %v712_v32, %v711_v31  ;;  %v1024_v41 = vmax.f32 %v885_v33, 0.0 }
 0x18d   : > { %924 = vmatmul.bf16.gmra.mxu1 %v760_v35 }
 0x190   : > { %v601_v38 = vpop.f32.mrf.mxu0 }
 0x191   : > { %v713_v45 = vmax.f32 %v601_v38, 0.0 }
 0x192   : > { %v887_v39 = vpop.f32.mrf.mxu1 }
 0x193   : > { %v1025_v42 = vmax.f32 %v887_v39, 0.0  ;;  %2023 = vmatmul.msk.bf16.gmra.mxu0 %vm415_vm0, %v2185_v37 }
 0x195   : > { %v1081_v43 = vpack.c.bf16 %v1025_v42, %v1024_v41 }
 0x197   : > { %1214 = vmatmul.bf16.gmra.mxu2 %v1081_v43 }
 0x198   : > { %v603_v44 = vpop.f32.mrf.mxu0 }
 0x199   : > { %v714_v46 = vmax.f32 %v603_v44, 0.0 }
 0x19a   : > { %v890_v47 = vpop.f32.mrf.mxu1 }
 0x19b   : > { %v761_v48 = vpack.c.bf16 %v714_v46, %v713_v45  ;;  %v1026_v52 = vmax.f32 %v890_v47, 0.0  ;;  %v2190_v45 = vld [vmem:[%s2468_s22 + $0xe8] sm:$0xff] }
 0x19d   : > { %929 = vmatmul.bf16.gmra.mxu1 %v761_v48 }
 0x1a0   : > { %v606_v50 = vpop.f32.mrf.mxu0 }
 0x1a1   : > { %v715_v56 = vmax.f32 %v606_v50, 0.0 }
 0x1a2   : > { %v892_v51 = vpop.f32.mrf.mxu1 }
 0x1a3   : > { %v1027_v53 = vmax.f32 %v892_v51, 0.0  ;;  %2024 = vmatmul.msk.bf16.gmra.mxu0 %vm415_vm0, %v2186_v49 }
 0x1a5   : > { %v1082_v54 = vpack.c.bf16 %v1027_v53, %v1026_v52 }
 0x1a7   : > { %1219 = vmatmul.bf16.gmra.mxu2 %v1082_v54 }
 0x1a8   : > { %v608_v55 = vpop.f32.mrf.mxu0 }
 0x1a9   : > { %v716_v57 = vmax.f32 %v608_v55, 0.0 }
 0x1aa   : > { %v895_v58 = vpop.f32.mrf.mxu1  ;;  %v1180_v59 = vpop.f32.mrf.mxu2 }
 0x1ab   : > { %v762_v60 = vpack.c.bf16 %v716_v57, %v715_v56  ;;  %v1028_v1 = vmax.f32 %v895_v58, 0.0  ;;  %v1340_v2 = vmax.f32 %v1180_v59, 0.0 }
 0x1ad   : > { %934 = vmatmul.bf16.gmra.mxu1 %v762_v60 }
 0x1b0   : > { %v611_v62 = vpop.f32.mrf.mxu0 }
 0x1b1   : > { %v717_v8 = vmax.f32 %v611_v62, 0.0 }
 0x1b2   : > { %v897_v63 = vpop.f32.mrf.mxu1  ;;  %v1182_v0 = vpop.f32.mrf.mxu2 }
 0x1b3   : > { %v1029_v3 = vmax.f32 %v897_v63, 0.0  ;;  %v1341_v4 = vmax.f32 %v1182_v0, 0.0  ;;  %2025 = vmatmul.msk.bf16.gmra.mxu0 %vm415_vm0, %v2187_v61  ;;  %v2191_v61 = vld [vmem:[%s2468_s22 + $0xf0] sm:$0xff] }
 0x1b5   : > { %v1083_v5 = vpack.c.bf16 %v1029_v3, %v1028_v1  ;;  %v1404_v6 = vpack.c.bf16 %v1341_v4, %v1340_v2 }
 0x1b7   : > { %1224 = vmatmul.bf16.gmra.mxu2 %v1083_v5  ;;  %1509 = vmatmul.bf16.vlgmr.msra.gmra.mxu3 %v1404_v6 }
 0x1b8   : > { %v613_v7 = vpop.f32.mrf.mxu0 }
 0x1b9   : > { %v718_v9 = vmax.f32 %v613_v7, 0.0 }
 0x1ba   : > { %v900_v10 = vpop.f32.mrf.mxu1  ;;  %v1185_v11 = vpop.f32.mrf.mxu2 }
 0x1bb   : > { %v763_v12 = vpack.c.bf16 %v718_v9, %v717_v8  ;;  %v1030_v17 = vmax.f32 %v900_v10, 0.0  ;;  %v1342_v18 = vmax.f32 %v1185_v11, 0.0 }
 0x1bd   : > { %939 = vmatmul.bf16.gmra.mxu1 %v763_v12 }
 0x1c0   : > { %v616_v14 = vpop.f32.mrf.mxu0 }
 0x1c1   : > { %v719_v24 = vmax.f32 %v616_v14, 0.0 }
 0x1c2   : > { %v902_v15 = vpop.f32.mrf.mxu1  ;;  %v1187_v16 = vpop.f32.mrf.mxu2 }
 0x1c3   : > { %v1031_v19 = vmax.f32 %v902_v15, 0.0  ;;  %v1343_v20 = vmax.f32 %v1187_v16, 0.0  ;;  %2026 = vmatmul.msk.bf16.gmra.mxu0 %vm415_vm0, %v2188_v13  ;;  %v2192_v13 = vld [vmem:[%s2468_s22 + $0xf8] sm:$0xff] }
 0x1c5   : > { %v1084_v21 = vpack.c.bf16 %v1031_v19, %v1030_v17  ;;  %v1405_v22 = vpack.c.bf16 %v1343_v20, %v1342_v18 }
 0x1c7   : > { %1229 = vmatmul.bf16.gmra.mxu2 %v1084_v21  ;;  %1514 = vmatmul.bf16.gmra.mxu3 %v1405_v22 }
 0x1c8   : > { %v618_v23 = vpop.f32.mrf.mxu0 }
 0x1c9   : > { %v720_v25 = vmax.f32 %v618_v23, 0.0 }
 0x1ca   : > { %v905_v26 = vpop.f32.mrf.mxu1  ;;  %v1190_v27 = vpop.f32.mrf.mxu2 }
 0x1cb   : > { %v764_v28 = vpack.c.bf16 %v720_v25, %v719_v24  ;;  %v1032_v33 = vmax.f32 %v905_v26, 0.0  ;;  %v1344_v34 = vmax.f32 %v1190_v27, 0.0 }
 0x1cd   : > { %944 = vmatmul.bf16.gmra.mxu1 %v764_v28 }
 0x1d0   : > { %v621_v30 = vpop.f32.mrf.mxu0 }
 0x1d1   : > { %v721_v40 = vmax.f32 %v621_v30, 0.0 }
 0x1d2   : > { %v907_v31 = vpop.f32.mrf.mxu1  ;;  %v1192_v32 = vpop.f32.mrf.mxu2 }
 0x1d3   : > { %v1033_v35 = vmax.f32 %v907_v31, 0.0  ;;  %v1345_v36 = vmax.f32 %v1192_v32, 0.0  ;;  %2027 = vmatmul.msk.bf16.gmra.mxu0 %vm415_vm0, %v2189_v29 }
 0x1d5   : > { %v1085_v37 = vpack.c.bf16 %v1033_v35, %v1032_v33  ;;  %v1406_v38 = vpack.c.bf16 %v1345_v36, %v1344_v34 }
 0x1d7   : > { %1234 = vmatmul.bf16.gmra.mxu2 %v1085_v37  ;;  %1519 = vmatmul.bf16.gmra.mxu3 %v1406_v38 }
 0x1d8   : > { %v623_v39 = vpop.f32.mrf.mxu0 }
 0x1d9   : > { %v722_v41 = vmax.f32 %v623_v39, 0.0 }
 0x1da   : > { %v910_v42 = vpop.f32.mrf.mxu1  ;;  %v1195_v43 = vpop.f32.mrf.mxu2 }
 0x1db   : > { %v765_v44 = vpack.c.bf16 %v722_v41, %v721_v40  ;;  %v1034_v49 = vmax.f32 %v910_v42, 0.0  ;;  %v1346_v50 = vmax.f32 %v1195_v43, 0.0 }
 0x1dd   : > { %949 = vmatmul.bf16.gmra.mxu1 %v765_v44 }
 0x1e0   : > { %v626_v46 = vpop.f32.mrf.mxu0 }
 0x1e1   : > { %v723_v56 = vmax.f32 %v626_v46, 0.0 }
 0x1e2   : > { %v912_v47 = vpop.f32.mrf.mxu1  ;;  %v1197_v48 = vpop.f32.mrf.mxu2 }
 0x1e3   : > { %v1035_v51 = vmax.f32 %v912_v47, 0.0  ;;  %v1347_v52 = vmax.f32 %v1197_v48, 0.0  ;;  %2028 = vmatmul.msk.bf16.gmra.mxu0 %vm415_vm0, %v2190_v45 }
 0x1e5   : > { %v1086_v53 = vpack.c.bf16 %v1035_v51, %v1034_v49  ;;  %v1407_v54 = vpack.c.bf16 %v1347_v52, %v1346_v50 }
 0x1e7   : > { %1239 = vmatmul.bf16.gmra.mxu2 %v1086_v53  ;;  %1524 = vmatmul.bf16.gmra.mxu3 %v1407_v54 }
 0x1e8   : > { %v628_v55 = vpop.f32.mrf.mxu0 }
 0x1e9   : > { %v724_v57 = vmax.f32 %v628_v55, 0.0 }
 0x1ea   : > { %v915_v58 = vpop.f32.mrf.mxu1  ;;  %v1200_v59 = vpop.f32.mrf.mxu2 }
 0x1eb   : > { %v766_v60 = vpack.c.bf16 %v724_v57, %v723_v56  ;;  %v1036_v1 = vmax.f32 %v915_v58, 0.0  ;;  %v1348_v2 = vmax.f32 %v1200_v59, 0.0 }
 0x1ed   : > { %954 = vmatmul.bf16.gmra.mxu1 %v766_v60 }
 0x1f0   : > { %v631_v62 = vpop.f32.mrf.mxu0 }
 0x1f1   : > { %v725_v8 = vmax.f32 %v631_v62, 0.0 }
 0x1f2   : > { %v917_v63 = vpop.f32.mrf.mxu1  ;;  %v1202_v0 = vpop.f32.mrf.mxu2 }
 0x1f3   : > { %v1037_v3 = vmax.f32 %v917_v63, 0.0  ;;  %v1349_v4 = vmax.f32 %v1202_v0, 0.0  ;;  %2029 = vmatmul.msk.bf16.gmra.mxu0 %vm415_vm0, %v2191_v61 }
 0x1f5   : > { %v1087_v5 = vpack.c.bf16 %v1037_v3, %v1036_v1  ;;  %v1408_v6 = vpack.c.bf16 %v1349_v4, %v1348_v2 }
 0x1f7   : > { %1244 = vmatmul.bf16.gmra.mxu2 %v1087_v5  ;;  %1529 = vmatmul.bf16.gmra.mxu3 %v1408_v6 }
 0x1f8   : > { %v633_v7 = vpop.f32.mrf.mxu0 }
 0x1f9   : > { %v726_v9 = vmax.f32 %v633_v7, 0.0 }
 0x1fa   : > { %v920_v10 = vpop.f32.mrf.mxu1  ;;  %v1205_v11 = vpop.f32.mrf.mxu2 }
 0x1fb   : > { %v767_v12 = vpack.c.bf16 %v726_v9, %v725_v8  ;;  %v1038_v17 = vmax.f32 %v920_v10, 0.0  ;;  %v1350_v18 = vmax.f32 %v1205_v11, 0.0 }
 0x1fd   : > { %959 = vmatmul.bf16.gmra.mxu1 %v767_v12 }
 0x200   : > { %v636_v14 = vpop.f32.mrf.mxu0 }
 0x201   : > { %v727_v24 = vmax.f32 %v636_v14, 0.0 }
 0x202   : > { %v922_v15 = vpop.f32.mrf.mxu1  ;;  %v1207_v16 = vpop.f32.mrf.mxu2 }
 0x203   : > { %v1039_v19 = vmax.f32 %v922_v15, 0.0  ;;  %v1351_v20 = vmax.f32 %v1207_v16, 0.0  ;;  %2030 = vmatmul.msk.bf16.gmra.mxu0 %vm415_vm0, %v2192_v13 }
 0x205   : > { %v1088_v21 = vpack.c.bf16 %v1039_v19, %v1038_v17  ;;  %v1409_v22 = vpack.c.bf16 %v1351_v20, %v1350_v18 }
 0x207   : > { %1249 = vmatmul.bf16.gmra.mxu2 %v1088_v21  ;;  %1534 = vmatmul.bf16.gmra.mxu3 %v1409_v22 }
 0x208   : > { %v638_v23 = vpop.f32.mrf.mxu0 }
 0x209   : > { %v728_v25 = vmax.f32 %v638_v23, 0.0 }
 0x20a   : > { %v925_v26 = vpop.f32.mrf.mxu1  ;;  %v1210_v27 = vpop.f32.mrf.mxu2 }
 0x20b   : > { %v768_v28 = vpack.c.bf16 %v728_v25, %v727_v24  ;;  %v1040_v32 = vmax.f32 %v925_v26, 0.0  ;;  %v1352_v33 = vmax.f32 %v1210_v27, 0.0 }
 0x20d   : > { %964 = vmatmul.bf16.gmra.mxu1 %v768_v28 }
 0x210   : > { %v641_v29 = vpop.f32.mrf.mxu0 }
 0x211   : > { %v729_v39 = vmax.f32 %v641_v29, 0.0 }
 0x212   : > { %v927_v30 = vpop.f32.mrf.mxu1  ;;  %v1212_v31 = vpop.f32.mrf.mxu2 }
 0x213   : > { %v1041_v34 = vmax.f32 %v927_v30, 0.0  ;;  %v1353_v35 = vmax.f32 %v1212_v31, 0.0 }
 0x215   : > { %v1089_v36 = vpack.c.bf16 %v1041_v34, %v1040_v32  ;;  %v1410_v37 = vpack.c.bf16 %v1353_v35, %v1352_v33 }
 0x217   : > { %1254 = vmatmul.bf16.gmra.mxu2 %v1089_v36  ;;  %1539 = vmatmul.bf16.gmra.mxu3 %v1410_v37 }
 0x218   : > { %v643_v38 = vpop.f32.mrf.mxu0 }
 0x219   : > { %v730_v40 = vmax.f32 %v643_v38, 0.0 }
 0x21a   : > { %v930_v41 = vpop.f32.mrf.mxu1  ;;  %v1215_v42 = vpop.f32.mrf.mxu2 }
 0x21b   : > { %v769_v43 = vpack.c.bf16 %v730_v40, %v729_v39  ;;  %v1042_v47 = vmax.f32 %v930_v41, 0.0  ;;  %v1354_v48 = vmax.f32 %v1215_v42, 0.0 }
 0x21d   : > { %969 = vmatmul.bf16.gmra.mxu1 %v769_v43 }
 0x220   : > { %v646_v44 = vpop.f32.mrf.mxu0 }
 0x221   : > { %v731_v54 = vmax.f32 %v646_v44, 0.0 }
 0x222   : > { %v932_v45 = vpop.f32.mrf.mxu1  ;;  %v1217_v46 = vpop.f32.mrf.mxu2 }
 0x223   : > { %v1043_v49 = vmax.f32 %v932_v45, 0.0  ;;  %v1355_v50 = vmax.f32 %v1217_v46, 0.0 }
 0x225   : > { %v1090_v51 = vpack.c.bf16 %v1043_v49, %v1042_v47  ;;  %v1411_v52 = vpack.c.bf16 %v1355_v50, %v1354_v48 }
 0x227   : > { %1259 = vmatmul.bf16.gmra.mxu2 %v1090_v51  ;;  %1544 = vmatmul.bf16.gmra.mxu3 %v1411_v52 }
 0x228   : > { %v648_v53 = vpop.f32.mrf.mxu0 }
 0x229   : > { %v732_v55 = vmax.f32 %v648_v53, 0.0 }
 0x22a   : > { %v935_v56 = vpop.f32.mrf.mxu1  ;;  %v1220_v57 = vpop.f32.mrf.mxu2 }
 0x22b   : > { %v770_v58 = vpack.c.bf16 %v732_v55, %v731_v54  ;;  %v1044_v62 = vmax.f32 %v935_v56, 0.0  ;;  %v1356_v63 = vmax.f32 %v1220_v57, 0.0 }
 0x22d   : > { %974 = vmatmul.bf16.gmra.mxu1 %v770_v58 }
 0x230   : > { %v651_v59 = vpop.f32.mrf.mxu0 }
 0x231   : > { %v733_v5 = vmax.f32 %v651_v59, 0.0 }
 0x232   : > { %v937_v60 = vpop.f32.mrf.mxu1  ;;  %v1222_v61 = vpop.f32.mrf.mxu2 }
 0x233   : > { %v1045_v0 = vmax.f32 %v937_v60, 0.0  ;;  %v1357_v1 = vmax.f32 %v1222_v61, 0.0 }
 0x235   : > { %v1091_v2 = vpack.c.bf16 %v1045_v0, %v1044_v62  ;;  %v1412_v3 = vpack.c.bf16 %v1357_v1, %v1356_v63 }
 0x237   : > { %1264 = vmatmul.bf16.gmra.mxu2 %v1091_v2  ;;  %1549 = vmatmul.bf16.gmra.mxu3 %v1412_v3 }
 0x238   : > { %v653_v4 = vpop.f32.mrf.mxu0 }
 0x239   : > { %v734_v6 = vmax.f32 %v653_v4, 0.0 }
 0x23a   : > { %v940_v7 = vpop.f32.mrf.mxu1  ;;  %v1225_v8 = vpop.f32.mrf.mxu2 }
 0x23b   : > { %v771_v9 = vpack.c.bf16 %v734_v6, %v733_v5  ;;  %v1510_v10 = vpop.f32.mrf.mxu3  ;;  %v1046_v14 = vmax.f32 %v940_v7, 0.0  ;;  %v1358_v15 = vmax.f32 %v1225_v8, 0.0 }
 0x23d   : > { %979 = vmatmul.bf16.gmra.mxu1 %v771_v9 }
 0x240   : > { %v656_v11 = vpop.f32.mrf.mxu0 }
 0x241   : > { %v735_v23 = vmax.f32 %v656_v11, 0.0 }
 0x242   : > { %v942_v12 = vpop.f32.mrf.mxu1  ;;  %v1227_v13 = vpop.f32.mrf.mxu2 }
 0x243   : > { %v1047_v16 = vmax.f32 %v942_v12, 0.0  ;;  %v1359_v17 = vmax.f32 %v1227_v13, 0.0  ;;  %v1512_v18 = vpop.f32.mrf.mxu3 }
 0x244   : > { %v2222_v19 = vpack.c.bf16 %v1512_v18, %v1510_v10 }
 0x245   : > { %v1092_v20 = vpack.c.bf16 %v1047_v16, %v1046_v14  ;;  %v1413_v21 = vpack.c.bf16 %v1359_v17, %v1358_v15 }
 0x246   : > { %2223 = vst [vmem:[%s2611_s26] sm:$0xff] %v2222_v19  }
 0x247   : > { %1269 = vmatmul.bf16.gmra.mxu2 %v1092_v20  ;;  %1554 = vmatmul.bf16.gmra.mxu3 %v1413_v21 }
 0x248   : > { %v658_v22 = vpop.f32.mrf.mxu0 }
 0x249   : > { %v736_v24 = vmax.f32 %v658_v22, 0.0 }
 0x24a   : > { %v945_v25 = vpop.f32.mrf.mxu1  ;;  %v1230_v26 = vpop.f32.mrf.mxu2 }
 0x24b   : > { %v772_v27 = vpack.c.bf16 %v736_v24, %v735_v23  ;;  %v1515_v28 = vpop.f32.mrf.mxu3  ;;  %v1048_v32 = vmax.f32 %v945_v25, 0.0  ;;  %v1360_v33 = vmax.f32 %v1230_v26, 0.0 }
 0x24d   : > { %984 = vmatmul.bf16.gmra.mxu1 %v772_v27 }
 0x250   : > { %v661_v29 = vpop.f32.mrf.mxu0 }
 0x251   : > { %v737_v41 = vmax.f32 %v661_v29, 0.0 }
 0x252   : > { %v947_v30 = vpop.f32.mrf.mxu1  ;;  %v1232_v31 = vpop.f32.mrf.mxu2 }
 0x253   : > { %v1049_v34 = vmax.f32 %v947_v30, 0.0  ;;  %v1361_v35 = vmax.f32 %v1232_v31, 0.0  ;;  %v1517_v36 = vpop.f32.mrf.mxu3 }
 0x254   : > { %v2227_v37 = vpack.c.bf16 %v1517_v36, %v1515_v28 }
 0x255   : > { %v1093_v38 = vpack.c.bf16 %v1049_v34, %v1048_v32  ;;  %v1414_v39 = vpack.c.bf16 %v1361_v35, %v1360_v33 }
 0x256   : > { %2379 = vst [vmem:[%s2611_s26 + $0x8] sm:$0xff] %v2227_v37  }
 0x257   : > { %1274 = vmatmul.bf16.gmra.mxu2 %v1093_v38  ;;  %1559 = vmatmul.bf16.gmra.mxu3 %v1414_v39 }
 0x258   : > { %v663_v40 = vpop.f32.mrf.mxu0 }
 0x259   : > { %v738_v42 = vmax.f32 %v663_v40, 0.0 }
 0x25a   : > { %v950_v43 = vpop.f32.mrf.mxu1  ;;  %v1235_v44 = vpop.f32.mrf.mxu2 }
 0x25b   : > { %v773_v45 = vpack.c.bf16 %v738_v42, %v737_v41  ;;  %v1520_v46 = vpop.f32.mrf.mxu3  ;;  %v1050_v50 = vmax.f32 %v950_v43, 0.0  ;;  %v1362_v51 = vmax.f32 %v1235_v44, 0.0 }
 0x25d   : > { %989 = vmatmul.bf16.gmra.mxu1 %v773_v45 }
 0x260   : > { %v666_v47 = vpop.f32.mrf.mxu0 }
 0x261   : > { %v739_v59 = vmax.f32 %v666_v47, 0.0 }
 0x262   : > { %v952_v48 = vpop.f32.mrf.mxu1  ;;  %v1237_v49 = vpop.f32.mrf.mxu2 }
 0x263   : > { %v1051_v52 = vmax.f32 %v952_v48, 0.0  ;;  %v1363_v53 = vmax.f32 %v1237_v49, 0.0  ;;  %v1522_v54 = vpop.f32.mrf.mxu3 }
 0x264   : > { %v2232_v55 = vpack.c.bf16 %v1522_v54, %v1520_v46 }
 0x265   : > { %v1094_v56 = vpack.c.bf16 %v1051_v52, %v1050_v50  ;;  %v1415_v57 = vpack.c.bf16 %v1363_v53, %v1362_v51 }
 0x266   : > { %2380 = vst [vmem:[%s2611_s26 + $0x10] sm:$0xff] %v2232_v55  }
 0x267   : > { %1279 = vmatmul.bf16.gmra.mxu2 %v1094_v56  ;;  %1564 = vmatmul.bf16.gmra.mxu3 %v1415_v57 }
 0x268   : > { %v668_v58 = vpop.f32.mrf.mxu0 }
 0x269   : > { %v740_v60 = vmax.f32 %v668_v58, 0.0 }
 0x26a   : > { %v955_v61 = vpop.f32.mrf.mxu1  ;;  %v1240_v62 = vpop.f32.mrf.mxu2 }
 0x26b   : > { %v774_v63 = vpack.c.bf16 %v740_v60, %v739_v59  ;;  %v1525_v0 = vpop.f32.mrf.mxu3  ;;  %v1052_v4 = vmax.f32 %v955_v61, 0.0  ;;  %v1364_v5 = vmax.f32 %v1240_v62, 0.0 }
 0x26d   : > { %994 = vmatmul.bf16.gmra.mxu1 %v774_v63 }
 0x270   : > { %v671_v1 = vpop.f32.mrf.mxu0 }
 0x271   : > { %v741_v13 = vmax.f32 %v671_v1, 0.0 }
 0x272   : > { %v957_v2 = vpop.f32.mrf.mxu1  ;;  %v1242_v3 = vpop.f32.mrf.mxu2 }
 0x273   : > { %v1053_v6 = vmax.f32 %v957_v2, 0.0  ;;  %v1365_v7 = vmax.f32 %v1242_v3, 0.0  ;;  %v1527_v8 = vpop.f32.mrf.mxu3 }
 0x274   : > { %v2237_v9 = vpack.c.bf16 %v1527_v8, %v1525_v0 }
 0x275   : > { %v1095_v10 = vpack.c.bf16 %v1053_v6, %v1052_v4  ;;  %v1416_v11 = vpack.c.bf16 %v1365_v7, %v1364_v5 }
 0x276   : > { %2381 = vst [vmem:[%s2611_s26 + $0x18] sm:$0xff] %v2237_v9  }
 0x277   : > { %1284 = vmatmul.bf16.gmra.mxu2 %v1095_v10  ;;  %1569 = vmatmul.bf16.gmra.mxu3 %v1416_v11 }
 0x278   : > { %v673_v12 = vpop.f32.mrf.mxu0 }
 0x279   : > { %v742_v14 = vmax.f32 %v673_v12, 0.0 }
 0x27a   : > { %v960_v15 = vpop.f32.mrf.mxu1  ;;  %v1245_v16 = vpop.f32.mrf.mxu2 }
 0x27b   : > { %v775_v17 = vpack.c.bf16 %v742_v14, %v741_v13  ;;  %v1530_v18 = vpop.f32.mrf.mxu3  ;;  %v1054_v22 = vmax.f32 %v960_v15, 0.0  ;;  %v1366_v23 = vmax.f32 %v1245_v16, 0.0 }
 0x27d   : > { %999 = vmatmul.bf16.gmra.mxu1 %v775_v17 }
 0x280   : > { %v676_v19 = vpop.f32.mrf.mxu0 }
 0x281   : > { %v743_v31 = vmax.f32 %v676_v19, 0.0 }
 0x282   : > { %v962_v20 = vpop.f32.mrf.mxu1  ;;  %v1247_v21 = vpop.f32.mrf.mxu2 }
 0x283   : > { %v1055_v24 = vmax.f32 %v962_v20, 0.0  ;;  %v1367_v25 = vmax.f32 %v1247_v21, 0.0  ;;  %v1532_v26 = vpop.f32.mrf.mxu3 }
 0x284   : > { %v2242_v27 = vpack.c.bf16 %v1532_v26, %v1530_v18 }
 0x285   : > { %v1096_v28 = vpack.c.bf16 %v1055_v24, %v1054_v22  ;;  %v1417_v29 = vpack.c.bf16 %v1367_v25, %v1366_v23 }
 0x286   : > { %2382 = vst [vmem:[%s2611_s26 + $0x20] sm:$0xff] %v2242_v27  }
 0x287   : > { %1289 = vmatmul.bf16.gmra.mxu2 %v1096_v28  ;;  %1574 = vmatmul.bf16.gmra.mxu3 %v1417_v29 }
 0x288   : > { %v678_v30 = vpop.f32.mrf.mxu0 }
 0x289   : > { %v744_v32 = vmax.f32 %v678_v30, 0.0 }
 0x28a   : > { %v965_v33 = vpop.f32.mrf.mxu1  ;;  %v1250_v34 = vpop.f32.mrf.mxu2 }
 0x28b   : > { %v776_v35 = vpack.c.bf16 %v744_v32, %v743_v31  ;;  %v1535_v36 = vpop.f32.mrf.mxu3  ;;  %v1056_v39 = vmax.f32 %v965_v33, 0.0  ;;  %v1368_v40 = vmax.f32 %v1250_v34, 0.0 }
 0x28d   : > { %1004 = vmatmul.bf16.gmra.mxu1 %v776_v35 }
 0x292   : > { %v967_v37 = vpop.f32.mrf.mxu1  ;;  %v1252_v38 = vpop.f32.mrf.mxu2 }
 0x293   : > { %v1057_v41 = vmax.f32 %v967_v37, 0.0  ;;  %v1369_v42 = vmax.f32 %v1252_v38, 0.0  ;;  %v1537_v43 = vpop.f32.mrf.mxu3 }
 0x294   : > { %v2247_v44 = vpack.c.bf16 %v1537_v43, %v1535_v36 }
 0x295   : > { %v1097_v45 = vpack.c.bf16 %v1057_v41, %v1056_v39  ;;  %v1418_v46 = vpack.c.bf16 %v1369_v42, %v1368_v40 }
 0x296   : > { %2383 = vst [vmem:[%s2611_s26 + $0x28] sm:$0xff] %v2247_v44  }
 0x297   : > { %1294 = vmatmul.bf16.gmra.mxu2 %v1097_v45  ;;  %1579 = vmatmul.bf16.gmra.mxu3 %v1418_v46 }
 0x29a   : > { %v970_v47 = vpop.f32.mrf.mxu1  ;;  %v1255_v48 = vpop.f32.mrf.mxu2 }
 0x29b   : > { %v1540_v49 = vpop.f32.mrf.mxu3  ;;  %v1058_v52 = vmax.f32 %v970_v47, 0.0  ;;  %v1370_v53 = vmax.f32 %v1255_v48, 0.0 }
 0x2a2   : > { %v972_v50 = vpop.f32.mrf.mxu1  ;;  %v1257_v51 = vpop.f32.mrf.mxu2 }
 0x2a3   : > { %v1059_v54 = vmax.f32 %v972_v50, 0.0  ;;  %v1371_v55 = vmax.f32 %v1257_v51, 0.0  ;;  %v1542_v56 = vpop.f32.mrf.mxu3 }
 0x2a4   : > { %v2252_v57 = vpack.c.bf16 %v1542_v56, %v1540_v49 }
 0x2a5   : > { %v1098_v58 = vpack.c.bf16 %v1059_v54, %v1058_v52  ;;  %v1419_v59 = vpack.c.bf16 %v1371_v55, %v1370_v53 }
 0x2a6   : > { %2384 = vst [vmem:[%s2611_s26 + $0x30] sm:$0xff] %v2252_v57  }
 0x2a7   : > { %1299 = vmatmul.bf16.gmra.mxu2 %v1098_v58  ;;  %1584 = vmatmul.bf16.gmra.mxu3 %v1419_v59 }
 0x2aa   : > { %v975_v60 = vpop.f32.mrf.mxu1  ;;  %v1260_v61 = vpop.f32.mrf.mxu2 }
 0x2ab   : > { %v1545_v62 = vpop.f32.mrf.mxu3  ;;  %v1060_v1 = vmax.f32 %v975_v60, 0.0  ;;  %v1372_v2 = vmax.f32 %v1260_v61, 0.0 }
 0x2b2   : > { %v977_v63 = vpop.f32.mrf.mxu1  ;;  %v1262_v0 = vpop.f32.mrf.mxu2 }
 0x2b3   : > { %v1061_v3 = vmax.f32 %v977_v63, 0.0  ;;  %v1373_v4 = vmax.f32 %v1262_v0, 0.0  ;;  %v1547_v5 = vpop.f32.mrf.mxu3 }
 0x2b4   : > { %v2257_v6 = vpack.c.bf16 %v1547_v5, %v1545_v62 }
 0x2b5   : > { %v1099_v7 = vpack.c.bf16 %v1061_v3, %v1060_v1  ;;  %v1420_v8 = vpack.c.bf16 %v1373_v4, %v1372_v2 }
 0x2b6   : > { %2385 = vst [vmem:[%s2611_s26 + $0x38] sm:$0xff] %v2257_v6  }
 0x2b7   : > { %1304 = vmatmul.bf16.gmra.mxu2 %v1099_v7  ;;  %1589 = vmatmul.bf16.gmra.mxu3 %v1420_v8 }
 0x2ba   : > { %v980_v9 = vpop.f32.mrf.mxu1  ;;  %v1265_v10 = vpop.f32.mrf.mxu2 }
 0x2bb   : > { %v1550_v11 = vpop.f32.mrf.mxu3  ;;  %v1062_v14 = vmax.f32 %v980_v9, 0.0  ;;  %v1374_v15 = vmax.f32 %v1265_v10, 0.0 }
 0x2c2   : > { %v982_v12 = vpop.f32.mrf.mxu1  ;;  %v1267_v13 = vpop.f32.mrf.mxu2 }
 0x2c3   : > { %v1063_v16 = vmax.f32 %v982_v12, 0.0  ;;  %v1375_v17 = vmax.f32 %v1267_v13, 0.0  ;;  %v1552_v18 = vpop.f32.mrf.mxu3 }
 0x2c4   : > { %v2262_v19 = vpack.c.bf16 %v1552_v18, %v1550_v11 }
 0x2c5   : > { %v1100_v20 = vpack.c.bf16 %v1063_v16, %v1062_v14  ;;  %v1421_v21 = vpack.c.bf16 %v1375_v17, %v1374_v15 }
 0x2c6   : > { %2386 = vst [vmem:[%s2611_s26 + $0x40] sm:$0xff] %v2262_v19  }
 0x2c7   : > { %1309 = vmatmul.bf16.gmra.mxu2 %v1100_v20  ;;  %1594 = vmatmul.bf16.gmra.mxu3 %v1421_v21 }
 0x2ca   : > { %v985_v22 = vpop.f32.mrf.mxu1  ;;  %v1270_v23 = vpop.f32.mrf.mxu2 }
 0x2cb   : > { %v1555_v24 = vpop.f32.mrf.mxu3  ;;  %v1064_v27 = vmax.f32 %v985_v22, 0.0  ;;  %v1376_v28 = vmax.f32 %v1270_v23, 0.0 }
 0x2d2   : > { %v987_v25 = vpop.f32.mrf.mxu1  ;;  %v1272_v26 = vpop.f32.mrf.mxu2 }
 0x2d3   : > { %v1065_v29 = vmax.f32 %v987_v25, 0.0  ;;  %v1377_v30 = vmax.f32 %v1272_v26, 0.0  ;;  %v1557_v31 = vpop.f32.mrf.mxu3 }
 0x2d4   : > { %v2267_v32 = vpack.c.bf16 %v1557_v31, %v1555_v24 }
 0x2d5   : > { %v1101_v33 = vpack.c.bf16 %v1065_v29, %v1064_v27  ;;  %v1422_v34 = vpack.c.bf16 %v1377_v30, %v1376_v28 }
 0x2d6   : > { %2387 = vst [vmem:[%s2611_s26 + $0x48] sm:$0xff] %v2267_v32  }
 0x2d7   : > { %1314 = vmatmul.bf16.gmra.mxu2 %v1101_v33  ;;  %1599 = vmatmul.bf16.gmra.mxu3 %v1422_v34 }
 0x2da   : > { %v990_v35 = vpop.f32.mrf.mxu1  ;;  %v1275_v36 = vpop.f32.mrf.mxu2 }
 0x2db   : > { %v1560_v37 = vpop.f32.mrf.mxu3  ;;  %v1066_v40 = vmax.f32 %v990_v35, 0.0  ;;  %v1378_v41 = vmax.f32 %v1275_v36, 0.0 }
 0x2e2   : > { %v992_v38 = vpop.f32.mrf.mxu1  ;;  %v1277_v39 = vpop.f32.mrf.mxu2 }
 0x2e3   : > { %v1067_v42 = vmax.f32 %v992_v38, 0.0  ;;  %v1379_v43 = vmax.f32 %v1277_v39, 0.0  ;;  %v1562_v44 = vpop.f32.mrf.mxu3 }
 0x2e4   : > { %v2272_v45 = vpack.c.bf16 %v1562_v44, %v1560_v37 }
 0x2e5   : > { %v1102_v46 = vpack.c.bf16 %v1067_v42, %v1066_v40  ;;  %v1423_v47 = vpack.c.bf16 %v1379_v43, %v1378_v41 }
 0x2e6   : > { %2388 = vst [vmem:[%s2611_s26 + $0x50] sm:$0xff] %v2272_v45  }
 0x2e7   : > { %1319 = vmatmul.bf16.gmra.mxu2 %v1102_v46  ;;  %1604 = vmatmul.bf16.gmra.mxu3 %v1423_v47 }
 0x2ea   : > { %v995_v48 = vpop.f32.mrf.mxu1  ;;  %v1280_v49 = vpop.f32.mrf.mxu2 }
 0x2eb   : > { %v1565_v50 = vpop.f32.mrf.mxu3  ;;  %v1068_v53 = vmax.f32 %v995_v48, 0.0  ;;  %v1380_v54 = vmax.f32 %v1280_v49, 0.0 }
 0x2f2   : > { %v997_v51 = vpop.f32.mrf.mxu1  ;;  %v1282_v52 = vpop.f32.mrf.mxu2 }
 0x2f3   : > { %v1069_v55 = vmax.f32 %v997_v51, 0.0  ;;  %v1381_v56 = vmax.f32 %v1282_v52, 0.0  ;;  %v1567_v57 = vpop.f32.mrf.mxu3 }
 0x2f4   : > { %v2277_v58 = vpack.c.bf16 %v1567_v57, %v1565_v50 }
 0x2f5   : > { %v1103_v59 = vpack.c.bf16 %v1069_v55, %v1068_v53  ;;  %v1424_v60 = vpack.c.bf16 %v1381_v56, %v1380_v54 }
 0x2f6   : > { %2389 = vst [vmem:[%s2611_s26 + $0x58] sm:$0xff] %v2277_v58  }
 0x2f7   : > { %1324 = vmatmul.bf16.gmra.mxu2 %v1103_v59  ;;  %1609 = vmatmul.bf16.gmra.mxu3 %v1424_v60 }
 0x2fa   : > { %v1000_v61 = vpop.f32.mrf.mxu1  ;;  %v1285_v62 = vpop.f32.mrf.mxu2 }
 0x2fb   : > { %v1570_v63 = vpop.f32.mrf.mxu3  ;;  %v1070_v2 = vmax.f32 %v1000_v61, 0.0  ;;  %v1382_v3 = vmax.f32 %v1285_v62, 0.0 }
 0x302   : > { %v1002_v0 = vpop.f32.mrf.mxu1  ;;  %v1287_v1 = vpop.f32.mrf.mxu2 }
 0x303   : > { %v1071_v4 = vmax.f32 %v1002_v0, 0.0  ;;  %v1383_v5 = vmax.f32 %v1287_v1, 0.0  ;;  %v1572_v6 = vpop.f32.mrf.mxu3 }
 0x304   : > { %v2282_v7 = vpack.c.bf16 %v1572_v6, %v1570_v63 }
 0x305   : > { %v1104_v8 = vpack.c.bf16 %v1071_v4, %v1070_v2  ;;  %v1425_v9 = vpack.c.bf16 %v1383_v5, %v1382_v3 }
 0x306   : > { %2390 = vst [vmem:[%s2611_s26 + $0x60] sm:$0xff] %v2282_v7  }
 0x307   : > { %1329 = vmatmul.bf16.gmra.mxu2 %v1104_v8  ;;  %1614 = vmatmul.bf16.gmra.mxu3 %v1425_v9 }
 0x30a   : > { %v1005_v10 = vpop.f32.mrf.mxu1  ;;  %v1290_v11 = vpop.f32.mrf.mxu2 }
 0x30b   : > { %v1575_v12 = vpop.f32.mrf.mxu3  ;;  %v1072_v15 = vmax.f32 %v1005_v10, 0.0  ;;  %v1384_v16 = vmax.f32 %v1290_v11, 0.0 }
 0x312   : > { %v1007_v13 = vpop.f32.mrf.mxu1  ;;  %v1292_v14 = vpop.f32.mrf.mxu2 }
 0x313   : > { %v1073_v17 = vmax.f32 %v1007_v13, 0.0  ;;  %v1385_v18 = vmax.f32 %v1292_v14, 0.0  ;;  %v1577_v19 = vpop.f32.mrf.mxu3 }
 0x314   : > { %v2287_v20 = vpack.c.bf16 %v1577_v19, %v1575_v12 }
 0x315   : > { %v1105_v21 = vpack.c.bf16 %v1073_v17, %v1072_v15  ;;  %v1426_v22 = vpack.c.bf16 %v1385_v18, %v1384_v16 }
 0x316   : > { %2391 = vst [vmem:[%s2611_s26 + $0x68] sm:$0xff] %v2287_v20  }
 0x317   : > { %1334 = vmatmul.bf16.gmra.mxu2 %v1105_v21  ;;  %1619 = vmatmul.bf16.gmra.mxu3 %v1426_v22 }
 0x31a   : > { %v1295_v23 = vpop.f32.mrf.mxu2 }
 0x31b   : > { %v1580_v24 = vpop.f32.mrf.mxu3  ;;  %v1386_v26 = vmax.f32 %v1295_v23, 0.0 }
 0x322   : > { %v1297_v25 = vpop.f32.mrf.mxu2 }
 0x323   : > { %v1387_v27 = vmax.f32 %v1297_v25, 0.0  ;;  %v1582_v28 = vpop.f32.mrf.mxu3 }
 0x324   : > { %v2292_v29 = vpack.c.bf16 %v1582_v28, %v1580_v24 }
 0x325   : > { %v1427_v30 = vpack.c.bf16 %v1387_v27, %v1386_v26 }
 0x326   : > { %2392 = vst [vmem:[%s2611_s26 + $0x70] sm:$0xff] %v2292_v29  }
 0x327   : > { %1624 = vmatmul.bf16.gmra.mxu3 %v1427_v30 }
 0x32a   : > { %v1300_v31 = vpop.f32.mrf.mxu2 }
 0x32b   : > { %v1585_v32 = vpop.f32.mrf.mxu3  ;;  %v1388_v34 = vmax.f32 %v1300_v31, 0.0 }
 0x332   : > { %v1302_v33 = vpop.f32.mrf.mxu2 }
 0x333   : > { %v1389_v35 = vmax.f32 %v1302_v33, 0.0  ;;  %v1587_v36 = vpop.f32.mrf.mxu3 }
 0x334   : > { %v2297_v37 = vpack.c.bf16 %v1587_v36, %v1585_v32 }
 0x335   : > { %v1428_v38 = vpack.c.bf16 %v1389_v35, %v1388_v34 }
 0x336   : > { %2393 = vst [vmem:[%s2611_s26 + $0x78] sm:$0xff] %v2297_v37  }
 0x337   : > { %1629 = vmatmul.bf16.gmra.mxu3 %v1428_v38 }
 0x33a   : > { %v1305_v39 = vpop.f32.mrf.mxu2 }
 0x33b   : > { %v1590_v40 = vpop.f32.mrf.mxu3  ;;  %v1390_v42 = vmax.f32 %v1305_v39, 0.0 }
 0x342   : > { %v1307_v41 = vpop.f32.mrf.mxu2 }
 0x343   : > { %v1391_v43 = vmax.f32 %v1307_v41, 0.0  ;;  %v1592_v44 = vpop.f32.mrf.mxu3 }
 0x344   : > { %v2302_v45 = vpack.c.bf16 %v1592_v44, %v1590_v40 }
 0x345   : > { %v1429_v46 = vpack.c.bf16 %v1391_v43, %v1390_v42 }
 0x346   : > { %2394 = vst [vmem:[%s2611_s26 + $0x80] sm:$0xff] %v2302_v45  }
 0x347   : > { %1634 = vmatmul.bf16.gmra.mxu3 %v1429_v46 }
 0x34a   : > { %v1310_v47 = vpop.f32.mrf.mxu2 }
 0x34b   : > { %v1595_v48 = vpop.f32.mrf.mxu3  ;;  %v1392_v50 = vmax.f32 %v1310_v47, 0.0 }
 0x352   : > { %v1312_v49 = vpop.f32.mrf.mxu2 }
 0x353   : > { %v1393_v51 = vmax.f32 %v1312_v49, 0.0  ;;  %v1597_v52 = vpop.f32.mrf.mxu3 }
 0x354   : > { %v2307_v53 = vpack.c.bf16 %v1597_v52, %v1595_v48 }
 0x355   : > { %v1430_v54 = vpack.c.bf16 %v1393_v51, %v1392_v50 }
 0x356   : > { %2395 = vst [vmem:[%s2611_s26 + $0x88] sm:$0xff] %v2307_v53  }
 0x357   : > { %1639 = vmatmul.bf16.gmra.mxu3 %v1430_v54 }
 0x35a   : > { %v1315_v55 = vpop.f32.mrf.mxu2 }
 0x35b   : > { %v1600_v56 = vpop.f32.mrf.mxu3  ;;  %v1394_v58 = vmax.f32 %v1315_v55, 0.0 }
 0x362   : > { %v1317_v57 = vpop.f32.mrf.mxu2 }
 0x363   : > { %v1395_v59 = vmax.f32 %v1317_v57, 0.0  ;;  %v1602_v60 = vpop.f32.mrf.mxu3 }
 0x364   : > { %v2312_v61 = vpack.c.bf16 %v1602_v60, %v1600_v56 }
 0x365   : > { %v1431_v62 = vpack.c.bf16 %v1395_v59, %v1394_v58 }
 0x366   : > { %2396 = vst [vmem:[%s2611_s26 + $0x90] sm:$0xff] %v2312_v61  }
 0x367   : > { %1644 = vmatmul.bf16.gmra.mxu3 %v1431_v62 }
 0x36a   : > { %v1320_v63 = vpop.f32.mrf.mxu2 }
 0x36b   : > { %v1605_v0 = vpop.f32.mrf.mxu3  ;;  %v1396_v2 = vmax.f32 %v1320_v63, 0.0 }
 0x372   : > { %v1322_v1 = vpop.f32.mrf.mxu2 }
 0x373   : > { %v1397_v3 = vmax.f32 %v1322_v1, 0.0  ;;  %v1607_v4 = vpop.f32.mrf.mxu3 }
 0x374   : > { %v2317_v5 = vpack.c.bf16 %v1607_v4, %v1605_v0 }
 0x375   : > { %v1432_v6 = vpack.c.bf16 %v1397_v3, %v1396_v2 }
 0x376   : > { %2397 = vst [vmem:[%s2611_s26 + $0x98] sm:$0xff] %v2317_v5  }
 0x377   : > { %1649 = vmatmul.bf16.gmra.mxu3 %v1432_v6 }
 0x37a   : > { %v1325_v7 = vpop.f32.mrf.mxu2 }
 0x37b   : > { %v1610_v8 = vpop.f32.mrf.mxu3  ;;  %v1398_v10 = vmax.f32 %v1325_v7, 0.0 }
 0x382   : > { %v1327_v9 = vpop.f32.mrf.mxu2 }
 0x383   : > { %v1399_v11 = vmax.f32 %v1327_v9, 0.0  ;;  %v1612_v12 = vpop.f32.mrf.mxu3 }
 0x384   : > { %v2322_v13 = vpack.c.bf16 %v1612_v12, %v1610_v8 }
 0x385   : > { %v1433_v14 = vpack.c.bf16 %v1399_v11, %v1398_v10 }
 0x386   : > { %2398 = vst [vmem:[%s2611_s26 + $0xa0] sm:$0xff] %v2322_v13  }
 0x387   : > { %1654 = vmatmul.bf16.gmra.mxu3 %v1433_v14 }
 0x38a   : > { %v1330_v15 = vpop.f32.mrf.mxu2 }
 0x38b   : > { %v1615_v16 = vpop.f32.mrf.mxu3  ;;  %v1400_v18 = vmax.f32 %v1330_v15, 0.0 }
 0x392   : > { %v1332_v17 = vpop.f32.mrf.mxu2 }
 0x393   : > { %v1401_v19 = vmax.f32 %v1332_v17, 0.0  ;;  %v1617_v20 = vpop.f32.mrf.mxu3 }
 0x394   : > { %v2327_v21 = vpack.c.bf16 %v1617_v20, %v1615_v16 }
 0x395   : > { %v1434_v22 = vpack.c.bf16 %v1401_v19, %v1400_v18 }
 0x396   : > { %2399 = vst [vmem:[%s2611_s26 + $0xa8] sm:$0xff] %v2327_v21  }
 0x397   : > { %1659 = vmatmul.bf16.gmra.mxu3 %v1434_v22 }
 0x39a   : > { %v1335_v23 = vpop.f32.mrf.mxu2 }
 0x39b   : > { %v1620_v24 = vpop.f32.mrf.mxu3  ;;  %v1402_v26 = vmax.f32 %v1335_v23, 0.0 }
 0x3a2   : > { %v1337_v25 = vpop.f32.mrf.mxu2 }
 0x3a3   : > { %v1403_v27 = vmax.f32 %v1337_v25, 0.0  ;;  %v1622_v28 = vpop.f32.mrf.mxu3 }
 0x3a4   : > { %v2332_v29 = vpack.c.bf16 %v1622_v28, %v1620_v24 }
 0x3a5   : > { %v1435_v30 = vpack.c.bf16 %v1403_v27, %v1402_v26 }
 0x3a6   : > { %2400 = vst [vmem:[%s2611_s26 + $0xb0] sm:$0xff] %v2332_v29  }
 0x3a7   : > { %1664 = vmatmul.bf16.gmra.mxu3 %v1435_v30 }
 0x3ab   : > { %v1625_v31 = vpop.f32.mrf.mxu3 }
 0x3b3   : > { %v1627_v32 = vpop.f32.mrf.mxu3 }
 0x3b4   : > { %v2337_v33 = vpack.c.bf16 %v1627_v32, %v1625_v31 }
 0x3b6   : > { %2401 = vst [vmem:[%s2611_s26 + $0xb8] sm:$0xff] %v2337_v33  }
 0x3bb   : > { %v1630_v34 = vpop.f32.mrf.mxu3 }
 0x3c3   : > { %v1632_v35 = vpop.f32.mrf.mxu3 }
 0x3c4   : > { %v2342_v36 = vpack.c.bf16 %v1632_v35, %v1630_v34 }
 0x3c6   : > { %2402 = vst [vmem:[%s2611_s26 + $0xc0] sm:$0xff] %v2342_v36  }
 0x3cb   : > { %v1635_v37 = vpop.f32.mrf.mxu3 }
 0x3d3   : > { %v1637_v38 = vpop.f32.mrf.mxu3 }
 0x3d4   : > { %v2347_v39 = vpack.c.bf16 %v1637_v38, %v1635_v37 }
 0x3d6   : > { %2403 = vst [vmem:[%s2611_s26 + $0xc8] sm:$0xff] %v2347_v39  }
 0x3db   : > { %v1640_v40 = vpop.f32.mrf.mxu3 }
 0x3e3   : > { %v1642_v41 = vpop.f32.mrf.mxu3 }
 0x3e4   : > { %v2352_v42 = vpack.c.bf16 %v1642_v41, %v1640_v40 }
 0x3e6   : > { %2404 = vst [vmem:[%s2611_s26 + $0xd0] sm:$0xff] %v2352_v42  }
 0x3eb   : > { %v1645_v43 = vpop.f32.mrf.mxu3 }
 0x3f3   : > { %v1647_v44 = vpop.f32.mrf.mxu3 }
 0x3f4   : > { %v2357_v45 = vpack.c.bf16 %v1647_v44, %v1645_v43 }
 0x3f6   : > { %2405 = vst [vmem:[%s2611_s26 + $0xd8] sm:$0xff] %v2357_v45  }
 0x3fb   : > { %v1650_v46 = vpop.f32.mrf.mxu3 }
 0x403   : > { %v1652_v47 = vpop.f32.mrf.mxu3 }
 0x404   : > { %v2362_v48 = vpack.c.bf16 %v1652_v47, %v1650_v46 }
 0x406   : > { %2406 = vst [vmem:[%s2611_s26 + $0xe0] sm:$0xff] %v2362_v48  }
 0x40b   : > { %v1655_v49 = vpop.f32.mrf.mxu3 }
 0x413   : > { %v1657_v50 = vpop.f32.mrf.mxu3 }
 0x414   : > { %v2367_v51 = vpack.c.bf16 %v1657_v50, %v1655_v49 }
 0x416   : > { %2407 = vst [vmem:[%s2611_s26 + $0xe8] sm:$0xff] %v2367_v51  }
 0x41b   : > { %v1660_v52 = vpop.f32.mrf.mxu3 }
 0x423   : > { %v1662_v53 = vpop.f32.mrf.mxu3 }
 0x424   : > { %v2372_v54 = vpack.c.bf16 %v1662_v53, %v1660_v52 }
 0x426   : > { %2408 = vst [vmem:[%s2611_s26 + $0xf0] sm:$0xff] %v2372_v54  }
 0x42b   : > { %v1665_v55 = vpop.f32.mrf.mxu3 }
 0x433   : > { %v1667_v56 = vpop.f32.mrf.mxu3 }
 0x434   : > { %v2377_v57 = vpack.c.bf16 %v1667_v56, %v1665_v55 }
 0x436   : > { %2409 = vst [vmem:[%s2611_s26 + $0xf8] sm:$0xff] %v2377_v57  }
 0x437 PF: > { %s13_s12 = sadd.s32 1, %s2424_s12  }
 0x438   : > { %p10_p4 = scmp.ge.s32.totalorder %s13_s12, 4  }
 0x43a   :  { %12 = sbr.rel (!%p10_p4) target bundleno = 1 (0x1), region = 64 }

</bundles_post_ra>
